<compile_context>
chip_gen: v7x
topology: tpu7x:2x2x1
jax: 0.10.0
libtpu: 0.0.40
codegen_flags: <defaults>
</compile_context>

<pallas_src>
import jax
import jax.numpy as jnp
from jax.experimental import pallas as pl
from jax.experimental.pallas import tpu as pltpu


def _sigmoid(z):
    # One EUP push (tanh) instead of exp + reciprocal; mathematically exact.
    return 0.5 * jnp.tanh(0.5 * z) + 0.5


def mlp_l5_forward(x, params, *, max_tile_rows=512):
    """Forward pass of the 5-layer MLP.

    x:      (batch, in_features) float array (PyTorch nn.Linear input layout).
    params: [(w1, b1), ..., (w5, b5)] with w: (in, out) (transpose of
            nn.Linear.weight) and b: (out,).
    Returns (batch, out_features) float32.
    """
    batch, in_dim = x.shape
    dims = [(w.shape[0], w.shape[1]) for w, _ in params]
    out_dim = dims[-1][1]
    num_layers = len(dims)

    # ---- pack all parameters into two flat f32 arrays (one SMEM input each)
    w_flat = jnp.concatenate([w.reshape(-1).astype(jnp.float32) for w, _ in params])
    b_flat = jnp.concatenate([b.reshape(-1).astype(jnp.float32) for _, b in params])

    w_offsets, b_offsets = [], []
    w_cursor = b_cursor = 0
    for din, dout in dims:
        w_offsets.append(w_cursor)
        b_offsets.append(b_cursor)
        w_cursor += din * dout
        b_cursor += dout

    # ---- lay the batch out over sublanes x lanes: (in_dim, R, 128)
    b_pad = ((batch + 127) // 128) * 128
    x_t = x.astype(jnp.float32).T                      # (in_dim, batch)
    if b_pad != batch:
        # pad value 0 -> z ~= bias = -8 through the chain; sliced off at the end
        x_t = jnp.pad(x_t, ((0, 0), (0, b_pad - batch)))
    R = b_pad // 128
    x3 = x_t.reshape(in_dim, R, 128)

    # ---- tile the sublane-row axis
    #  * small batch (R not splittable into 8-aligned halves): single grid step
    #    -> no per-step pipeline overhead (best on single-TC v5e/v6e).
    #  * otherwise: >= 2 steps so the "parallel" axis uses both v7x TCs;
    #    cap tile size for VMEM hygiene (never the real limit here).
    if R % 16 == 0:
        tile_r = R // 2
        while tile_r > max_tile_rows and tile_r % 16 == 0:
            tile_r //= 2
    else:
        tile_r = R
    num_tiles = R // tile_r

    def kernel(x_ref, w_ref, b_ref, o_ref):
        # Per-feature activations as dense (tile_r, 128) blocks.
        rows = [x_ref[k] for k in range(in_dim)]
        for l, (din, dout) in enumerate(dims):
            wo = w_offsets[l]
            bo = b_offsets[l]
            last = l == num_layers - 1
            new_rows = []
            for j in range(dout):
                # bias folded into the first FMA; weights read as SMEM scalars
                acc = rows[0] * w_ref[wo + j] + b_ref[bo + j]
                for k in range(1, din):
                    acc = acc + rows[k] * w_ref[wo + k * dout + j]
                y = _sigmoid(acc)
                if last:
                    o_ref[j] = y.astype(o_ref.dtype)   # direct lane-dense store
                else:
                    new_rows.append(y)
            rows = new_rows

    # advisory cost estimate so XLA doesn't over-schedule around this micro-kernel
    flops = 2 * b_pad * sum(din * dout for din, dout in dims)
    transcendentals = b_pad * sum(dout for _, dout in dims)
    bytes_accessed = 4 * (x3.size + out_dim * b_pad + w_flat.size + b_flat.size)

    out3 = pl.pallas_call(
        kernel,
        out_shape=jax.ShapeDtypeStruct((out_dim, R, 128), jnp.float32),
        grid=(num_tiles,),
        in_specs=[
            pl.BlockSpec((in_dim, tile_r, 128), lambda i: (0, i, 0)),   # x blocks (VMEM)
            pl.BlockSpec(memory_space=pltpu.MemorySpace.SMEM),          # packed weights
            pl.BlockSpec(memory_space=pltpu.MemorySpace.SMEM),          # packed biases
        ],
        out_specs=pl.BlockSpec((out_dim, tile_r, 128), lambda i: (0, i, 0)),
        compiler_params=pltpu.CompilerParams(
            dimension_semantics=("parallel",)),                          # 2 TCs on v7x
        cost_estimate=pl.CostEstimate(
            flops=flops,
            transcendentals=transcendentals,
            bytes_accessed=bytes_accessed),
    )(x3, w_flat, b_flat)

    out_flat = out3.reshape(out_dim, b_pad)[:, :batch]
    if out_dim == 1:
        # logically a reshape -> avoid emitting an XLA transpose
        return out_flat.reshape(batch, 1)
    return out_flat.T


def init_params(key, input_size, output_size, w_std=0.01, b_init=-8.0):
    """Matches Model_MLP_L5.init_weights: normal_(mean=0, std=0.01), bias=-8.0."""
    dims = [(input_size, 3), (3, 3), (3, 3), (3, 3), (3, output_size)]
    params = []
    for din, dout in dims:
        key, sub = jax.random.split(key)
        w = (w_std * jax.random.normal(sub, (din, dout))).astype(jnp.float32)
        b = jnp.full((dout,), b_init, dtype=jnp.float32)
        params.append((w, b))
    return params


def reference_forward(x, params):
    h = x.astype(jnp.float32)
    for w, b in params:
        h = h @ w + b
        h = jax.nn.sigmoid(h)      # sigmoid after every layer, incl. the last
    return h


if __name__ == "__main__":
    key = jax.random.PRNGKey(0)
    k_in, k_params = jax.random.split(key)

    # main check: the module's default-ish shape (input_size=4, output_size=1)
    batch, input_size, output_size = 512, 4, 1
    x = jax.random.normal(k_in, (batch, input_size), dtype=jnp.float32)
    params = init_params(k_params, input_size, output_size)

    out = jax.block_until_ready(mlp_l5_forward(x, params))
    ref = reference_forward(x, params)
    assert out.shape == (batch, output_size)
    assert jnp.allclose(out, ref, atol=1e-5, rtol=1e-3), (
        float(jnp.max(jnp.abs(out - ref))))

    # secondary check: multi-tile grid (2 steps) and out_dim > 1 store path
    k_in2, k_params2 = jax.random.split(jax.random.PRNGKey(1))
    x2 = jax.random.normal(k_in2, (2048, 4), dtype=jnp.float32)
    params2 = init_params(k_params2, 4, 3)
    out2 = jax.block_until_ready(mlp_l5_forward(x2, params2))
    ref2 = reference_forward(x2, params2)
    assert out2.shape == (2048, 3)
    assert jnp.allclose(out2, ref2, atol=1e-5, rtol=1e-3), (
        float(jnp.max(jnp.abs(out2 - ref2))))

    print("KERNEL_OK")
</pallas_src>

<mosaic_0001>
module attributes {stable_mosaic.version = 11 : i64} {
  func.func @kernel(%arg0: i32, %arg1: memref<4x4x128xf32, #tpu.memory_space<vmem>>, %arg2: memref<42xf32, #tpu.memory_space<smem>>, %arg3: memref<13xf32, #tpu.memory_space<smem>>, %arg4: memref<1x4x128xf32, #tpu.memory_space<vmem>>) attributes {dimension_semantics = [#tpu.dimension_semantics<parallel>], iteration_bounds = array<i64: 1>, scalar_prefetch = 0 : i64, scratch_operands = 0 : i64, tpu.core_type = #tpu.core_type<tc>, window_params = [{transform_indices = @transform_0, window_bounds = array<i64: 4, 4, 128>}, {transform_indices = @transform_1, window_bounds = array<i64: 42>}, {transform_indices = @transform_2, window_bounds = array<i64: 13>}, {transform_indices = @transform_3, window_bounds = array<i64: 1, 4, 128>}]} {
    %c0 = arith.constant 0 : index
    %c0_0 = arith.constant 0 : index
    %c0_1 = arith.constant 0 : index
    %0 = vector.load %arg1[%c0, %c0_0, %c0_1] : memref<4x4x128xf32, #tpu.memory_space<vmem>>, vector<1x4x128xf32>
    %1 = vector.shape_cast %0 : vector<1x4x128xf32> to vector<4x128xf32>
    %c1 = arith.constant 1 : index
    %c0_2 = arith.constant 0 : index
    %c0_3 = arith.constant 0 : index
    %2 = vector.load %arg1[%c1, %c0_2, %c0_3] : memref<4x4x128xf32, #tpu.memory_space<vmem>>, vector<1x4x128xf32>
    %3 = vector.shape_cast %2 : vector<1x4x128xf32> to vector<4x128xf32>
    %c2 = arith.constant 2 : index
    %c0_4 = arith.constant 0 : index
    %c0_5 = arith.constant 0 : index
    %4 = vector.load %arg1[%c2, %c0_4, %c0_5] : memref<4x4x128xf32, #tpu.memory_space<vmem>>, vector<1x4x128xf32>
    %5 = vector.shape_cast %4 : vector<1x4x128xf32> to vector<4x128xf32>
    %c3 = arith.constant 3 : index
    %c0_6 = arith.constant 0 : index
    %c0_7 = arith.constant 0 : index
    %6 = vector.load %arg1[%c3, %c0_6, %c0_7] : memref<4x4x128xf32, #tpu.memory_space<vmem>>, vector<1x4x128xf32>
    %7 = vector.shape_cast %6 : vector<1x4x128xf32> to vector<4x128xf32>
    %c0_8 = arith.constant 0 : index
    %8 = memref.load %arg2[%c0_8] : memref<42xf32, #tpu.memory_space<smem>>
    %9 = vector.broadcast %8 : f32 to vector<4x128xf32>
    %10 = arith.mulf %1, %9 : vector<4x128xf32>
    %c0_9 = arith.constant 0 : index
    %11 = memref.load %arg3[%c0_9] : memref<13xf32, #tpu.memory_space<smem>>
    %12 = vector.broadcast %11 : f32 to vector<4x128xf32>
    %13 = arith.addf %10, %12 : vector<4x128xf32>
    %c3_10 = arith.constant 3 : index
    %14 = memref.load %arg2[%c3_10] : memref<42xf32, #tpu.memory_space<smem>>
    %15 = vector.broadcast %14 : f32 to vector<4x128xf32>
    %16 = arith.mulf %3, %15 : vector<4x128xf32>
    %17 = arith.addf %13, %16 : vector<4x128xf32>
    %c6 = arith.constant 6 : index
    %18 = memref.load %arg2[%c6] : memref<42xf32, #tpu.memory_space<smem>>
    %19 = vector.broadcast %18 : f32 to vector<4x128xf32>
    %20 = arith.mulf %5, %19 : vector<4x128xf32>
    %21 = arith.addf %17, %20 : vector<4x128xf32>
    %c9 = arith.constant 9 : index
    %22 = memref.load %arg2[%c9] : memref<42xf32, #tpu.memory_space<smem>>
    %23 = vector.broadcast %22 : f32 to vector<4x128xf32>
    %24 = arith.mulf %7, %23 : vector<4x128xf32>
    %25 = arith.addf %21, %24 : vector<4x128xf32>
    %cst = arith.constant 5.000000e-01 : f32
    %26 = vector.broadcast %cst : f32 to vector<4x128xf32>
    %27 = arith.mulf %26, %25 : vector<4x128xf32>
    %28 = math.tanh %27 : vector<4x128xf32>
    %cst_11 = arith.constant 5.000000e-01 : f32
    %29 = vector.broadcast %cst_11 : f32 to vector<4x128xf32>
    %30 = arith.mulf %29, %28 : vector<4x128xf32>
    %cst_12 = arith.constant 5.000000e-01 : f32
    %31 = vector.broadcast %cst_12 : f32 to vector<4x128xf32>
    %32 = arith.addf %30, %31 : vector<4x128xf32>
    %c1_13 = arith.constant 1 : index
    %33 = memref.load %arg2[%c1_13] : memref<42xf32, #tpu.memory_space<smem>>
    %34 = vector.broadcast %33 : f32 to vector<4x128xf32>
    %35 = arith.mulf %1, %34 : vector<4x128xf32>
    %c1_14 = arith.constant 1 : index
    %36 = memref.load %arg3[%c1_14] : memref<13xf32, #tpu.memory_space<smem>>
    %37 = vector.broadcast %36 : f32 to vector<4x128xf32>
    %38 = arith.addf %35, %37 : vector<4x128xf32>
    %c4 = arith.constant 4 : index
    %39 = memref.load %arg2[%c4] : memref<42xf32, #tpu.memory_space<smem>>
    %40 = vector.broadcast %39 : f32 to vector<4x128xf32>
    %41 = arith.mulf %3, %40 : vector<4x128xf32>
    %42 = arith.addf %38, %41 : vector<4x128xf32>
    %c7 = arith.constant 7 : index
    %43 = memref.load %arg2[%c7] : memref<42xf32, #tpu.memory_space<smem>>
    %44 = vector.broadcast %43 : f32 to vector<4x128xf32>
    %45 = arith.mulf %5, %44 : vector<4x128xf32>
    %46 = arith.addf %42, %45 : vector<4x128xf32>
    %c10 = arith.constant 10 : index
    %47 = memref.load %arg2[%c10] : memref<42xf32, #tpu.memory_space<smem>>
    %48 = vector.broadcast %47 : f32 to vector<4x128xf32>
    %49 = arith.mulf %7, %48 : vector<4x128xf32>
    %50 = arith.addf %46, %49 : vector<4x128xf32>
    %cst_15 = arith.constant 5.000000e-01 : f32
    %51 = vector.broadcast %cst_15 : f32 to vector<4x128xf32>
    %52 = arith.mulf %51, %50 : vector<4x128xf32>
    %53 = math.tanh %52 : vector<4x128xf32>
    %cst_16 = arith.constant 5.000000e-01 : f32
    %54 = vector.broadcast %cst_16 : f32 to vector<4x128xf32>
    %55 = arith.mulf %54, %53 : vector<4x128xf32>
    %cst_17 = arith.constant 5.000000e-01 : f32
    %56 = vector.broadcast %cst_17 : f32 to vector<4x128xf32>
    %57 = arith.addf %55, %56 : vector<4x128xf32>
    %c2_18 = arith.constant 2 : index
    %58 = memref.load %arg2[%c2_18] : memref<42xf32, #tpu.memory_space<smem>>
    %59 = vector.broadcast %58 : f32 to vector<4x128xf32>
    %60 = arith.mulf %1, %59 : vector<4x128xf32>
    %c2_19 = arith.constant 2 : index
    %61 = memref.load %arg3[%c2_19] : memref<13xf32, #tpu.memory_space<smem>>
    %62 = vector.broadcast %61 : f32 to vector<4x128xf32>
    %63 = arith.addf %60, %62 : vector<4x128xf32>
    %c5 = arith.constant 5 : index
    %64 = memref.load %arg2[%c5] : memref<42xf32, #tpu.memory_space<smem>>
    %65 = vector.broadcast %64 : f32 to vector<4x128xf32>
    %66 = arith.mulf %3, %65 : vector<4x128xf32>
    %67 = arith.addf %63, %66 : vector<4x128xf32>
    %c8 = arith.constant 8 : index
    %68 = memref.load %arg2[%c8] : memref<42xf32, #tpu.memory_space<smem>>
    %69 = vector.broadcast %68 : f32 to vector<4x128xf32>
    %70 = arith.mulf %5, %69 : vector<4x128xf32>
    %71 = arith.addf %67, %70 : vector<4x128xf32>
    %c11 = arith.constant 11 : index
    %72 = memref.load %arg2[%c11] : memref<42xf32, #tpu.memory_space<smem>>
    %73 = vector.broadcast %72 : f32 to vector<4x128xf32>
    %74 = arith.mulf %7, %73 : vector<4x128xf32>
    %75 = arith.addf %71, %74 : vector<4x128xf32>
    %cst_20 = arith.constant 5.000000e-01 : f32
    %76 = vector.broadcast %cst_20 : f32 to vector<4x128xf32>
    %77 = arith.mulf %76, %75 : vector<4x128xf32>
    %78 = math.tanh %77 : vector<4x128xf32>
    %cst_21 = arith.constant 5.000000e-01 : f32
    %79 = vector.broadcast %cst_21 : f32 to vector<4x128xf32>
    %80 = arith.mulf %79, %78 : vector<4x128xf32>
    %cst_22 = arith.constant 5.000000e-01 : f32
    %81 = vector.broadcast %cst_22 : f32 to vector<4x128xf32>
    %82 = arith.addf %80, %81 : vector<4x128xf32>
    %c12 = arith.constant 12 : index
    %83 = memref.load %arg2[%c12] : memref<42xf32, #tpu.memory_space<smem>>
    %84 = vector.broadcast %83 : f32 to vector<4x128xf32>
    %85 = arith.mulf %32, %84 : vector<4x128xf32>
    %c3_23 = arith.constant 3 : index
    %86 = memref.load %arg3[%c3_23] : memref<13xf32, #tpu.memory_space<smem>>
    %87 = vector.broadcast %86 : f32 to vector<4x128xf32>
    %88 = arith.addf %85, %87 : vector<4x128xf32>
    %c15 = arith.constant 15 : index
    %89 = memref.load %arg2[%c15] : memref<42xf32, #tpu.memory_space<smem>>
    %90 = vector.broadcast %89 : f32 to vector<4x128xf32>
    %91 = arith.mulf %57, %90 : vector<4x128xf32>
    %92 = arith.addf %88, %91 : vector<4x128xf32>
    %c18 = arith.constant 18 : index
    %93 = memref.load %arg2[%c18] : memref<42xf32, #tpu.memory_space<smem>>
    %94 = vector.broadcast %93 : f32 to vector<4x128xf32>
    %95 = arith.mulf %82, %94 : vector<4x128xf32>
    %96 = arith.addf %92, %95 : vector<4x128xf32>
    %cst_24 = arith.constant 5.000000e-01 : f32
    %97 = vector.broadcast %cst_24 : f32 to vector<4x128xf32>
    %98 = arith.mulf %97, %96 : vector<4x128xf32>
    %99 = math.tanh %98 : vector<4x128xf32>
    %cst_25 = arith.constant 5.000000e-01 : f32
    %100 = vector.broadcast %cst_25 : f32 to vector<4x128xf32>
    %101 = arith.mulf %100, %99 : vector<4x128xf32>
    %cst_26 = arith.constant 5.000000e-01 : f32
    %102 = vector.broadcast %cst_26 : f32 to vector<4x128xf32>
    %103 = arith.addf %101, %102 : vector<4x128xf32>
    %c13 = arith.constant 13 : index
    %104 = memref.load %arg2[%c13] : memref<42xf32, #tpu.memory_space<smem>>
    %105 = vector.broadcast %104 : f32 to vector<4x128xf32>
    %106 = arith.mulf %32, %105 : vector<4x128xf32>
    %c4_27 = arith.constant 4 : index
    %107 = memref.load %arg3[%c4_27] : memref<13xf32, #tpu.memory_space<smem>>
    %108 = vector.broadcast %107 : f32 to vector<4x128xf32>
    %109 = arith.addf %106, %108 : vector<4x128xf32>
    %c16 = arith.constant 16 : index
    %110 = memref.load %arg2[%c16] : memref<42xf32, #tpu.memory_space<smem>>
    %111 = vector.broadcast %110 : f32 to vector<4x128xf32>
    %112 = arith.mulf %57, %111 : vector<4x128xf32>
    %113 = arith.addf %109, %112 : vector<4x128xf32>
    %c19 = arith.constant 19 : index
    %114 = memref.load %arg2[%c19] : memref<42xf32, #tpu.memory_space<smem>>
    %115 = vector.broadcast %114 : f32 to vector<4x128xf32>
    %116 = arith.mulf %82, %115 : vector<4x128xf32>
    %117 = arith.addf %113, %116 : vector<4x128xf32>
    %cst_28 = arith.constant 5.000000e-01 : f32
    %118 = vector.broadcast %cst_28 : f32 to vector<4x128xf32>
    %119 = arith.mulf %118, %117 : vector<4x128xf32>
    %120 = math.tanh %119 : vector<4x128xf32>
    %cst_29 = arith.constant 5.000000e-01 : f32
    %121 = vector.broadcast %cst_29 : f32 to vector<4x128xf32>
    %122 = arith.mulf %121, %120 : vector<4x128xf32>
    %cst_30 = arith.constant 5.000000e-01 : f32
    %123 = vector.broadcast %cst_30 : f32 to vector<4x128xf32>
    %124 = arith.addf %122, %123 : vector<4x128xf32>
    %c14 = arith.constant 14 : index
    %125 = memref.load %arg2[%c14] : memref<42xf32, #tpu.memory_space<smem>>
    %126 = vector.broadcast %125 : f32 to vector<4x128xf32>
    %127 = arith.mulf %32, %126 : vector<4x128xf32>
    %c5_31 = arith.constant 5 : index
    %128 = memref.load %arg3[%c5_31] : memref<13xf32, #tpu.memory_space<smem>>
    %129 = vector.broadcast %128 : f32 to vector<4x128xf32>
    %130 = arith.addf %127, %129 : vector<4x128xf32>
    %c17 = arith.constant 17 : index
    %131 = memref.load %arg2[%c17] : memref<42xf32, #tpu.memory_space<smem>>
    %132 = vector.broadcast %131 : f32 to vector<4x128xf32>
    %133 = arith.mulf %57, %132 : vector<4x128xf32>
    %134 = arith.addf %130, %133 : vector<4x128xf32>
    %c20 = arith.constant 20 : index
    %135 = memref.load %arg2[%c20] : memref<42xf32, #tpu.memory_space<smem>>
    %136 = vector.broadcast %135 : f32 to vector<4x128xf32>
    %137 = arith.mulf %82, %136 : vector<4x128xf32>
    %138 = arith.addf %134, %137 : vector<4x128xf32>
    %cst_32 = arith.constant 5.000000e-01 : f32
    %139 = vector.broadcast %cst_32 : f32 to vector<4x128xf32>
    %140 = arith.mulf %139, %138 : vector<4x128xf32>
    %141 = math.tanh %140 : vector<4x128xf32>
    %cst_33 = arith.constant 5.000000e-01 : f32
    %142 = vector.broadcast %cst_33 : f32 to vector<4x128xf32>
    %143 = arith.mulf %142, %141 : vector<4x128xf32>
    %cst_34 = arith.constant 5.000000e-01 : f32
    %144 = vector.broadcast %cst_34 : f32 to vector<4x128xf32>
    %145 = arith.addf %143, %144 : vector<4x128xf32>
    %c21 = arith.constant 21 : index
    %146 = memref.load %arg2[%c21] : memref<42xf32, #tpu.memory_space<smem>>
    %147 = vector.broadcast %146 : f32 to vector<4x128xf32>
    %148 = arith.mulf %103, %147 : vector<4x128xf32>
    %c6_35 = arith.constant 6 : index
    %149 = memref.load %arg3[%c6_35] : memref<13xf32, #tpu.memory_space<smem>>
    %150 = vector.broadcast %149 : f32 to vector<4x128xf32>
    %151 = arith.addf %148, %150 : vector<4x128xf32>
    %c24 = arith.constant 24 : index
    %152 = memref.load %arg2[%c24] : memref<42xf32, #tpu.memory_space<smem>>
    %153 = vector.broadcast %152 : f32 to vector<4x128xf32>
    %154 = arith.mulf %124, %153 : vector<4x128xf32>
    %155 = arith.addf %151, %154 : vector<4x128xf32>
    %c27 = arith.constant 27 : index
    %156 = memref.load %arg2[%c27] : memref<42xf32, #tpu.memory_space<smem>>
    %157 = vector.broadcast %156 : f32 to vector<4x128xf32>
    %158 = arith.mulf %145, %157 : vector<4x128xf32>
    %159 = arith.addf %155, %158 : vector<4x128xf32>
    %cst_36 = arith.constant 5.000000e-01 : f32
    %160 = vector.broadcast %cst_36 : f32 to vector<4x128xf32>
    %161 = arith.mulf %160, %159 : vector<4x128xf32>
    %162 = math.tanh %161 : vector<4x128xf32>
    %cst_37 = arith.constant 5.000000e-01 : f32
    %163 = vector.broadcast %cst_37 : f32 to vector<4x128xf32>
    %164 = arith.mulf %163, %162 : vector<4x128xf32>
    %cst_38 = arith.constant 5.000000e-01 : f32
    %165 = vector.broadcast %cst_38 : f32 to vector<4x128xf32>
    %166 = arith.addf %164, %165 : vector<4x128xf32>
    %c22 = arith.constant 22 : index
    %167 = memref.load %arg2[%c22] : memref<42xf32, #tpu.memory_space<smem>>
    %168 = vector.broadcast %167 : f32 to vector<4x128xf32>
    %169 = arith.mulf %103, %168 : vector<4x128xf32>
    %c7_39 = arith.constant 7 : index
    %170 = memref.load %arg3[%c7_39] : memref<13xf32, #tpu.memory_space<smem>>
    %171 = vector.broadcast %170 : f32 to vector<4x128xf32>
    %172 = arith.addf %169, %171 : vector<4x128xf32>
    %c25 = arith.constant 25 : index
    %173 = memref.load %arg2[%c25] : memref<42xf32, #tpu.memory_space<smem>>
    %174 = vector.broadcast %173 : f32 to vector<4x128xf32>
    %175 = arith.mulf %124, %174 : vector<4x128xf32>
    %176 = arith.addf %172, %175 : vector<4x128xf32>
    %c28 = arith.constant 28 : index
    %177 = memref.load %arg2[%c28] : memref<42xf32, #tpu.memory_space<smem>>
    %178 = vector.broadcast %177 : f32 to vector<4x128xf32>
    %179 = arith.mulf %145, %178 : vector<4x128xf32>
    %180 = arith.addf %176, %179 : vector<4x128xf32>
    %cst_40 = arith.constant 5.000000e-01 : f32
    %181 = vector.broadcast %cst_40 : f32 to vector<4x128xf32>
    %182 = arith.mulf %181, %180 : vector<4x128xf32>
    %183 = math.tanh %182 : vector<4x128xf32>
    %cst_41 = arith.constant 5.000000e-01 : f32
    %184 = vector.broadcast %cst_41 : f32 to vector<4x128xf32>
    %185 = arith.mulf %184, %183 : vector<4x128xf32>
    %cst_42 = arith.constant 5.000000e-01 : f32
    %186 = vector.broadcast %cst_42 : f32 to vector<4x128xf32>
    %187 = arith.addf %185, %186 : vector<4x128xf32>
    %c23 = arith.constant 23 : index
    %188 = memref.load %arg2[%c23] : memref<42xf32, #tpu.memory_space<smem>>
    %189 = vector.broadcast %188 : f32 to vector<4x128xf32>
    %190 = arith.mulf %103, %189 : vector<4x128xf32>
    %c8_43 = arith.constant 8 : index
    %191 = memref.load %arg3[%c8_43] : memref<13xf32, #tpu.memory_space<smem>>
    %192 = vector.broadcast %191 : f32 to vector<4x128xf32>
    %193 = arith.addf %190, %192 : vector<4x128xf32>
    %c26 = arith.constant 26 : index
    %194 = memref.load %arg2[%c26] : memref<42xf32, #tpu.memory_space<smem>>
    %195 = vector.broadcast %194 : f32 to vector<4x128xf32>
    %196 = arith.mulf %124, %195 : vector<4x128xf32>
    %197 = arith.addf %193, %196 : vector<4x128xf32>
    %c29 = arith.constant 29 : index
    %198 = memref.load %arg2[%c29] : memref<42xf32, #tpu.memory_space<smem>>
    %199 = vector.broadcast %198 : f32 to vector<4x128xf32>
    %200 = arith.mulf %145, %199 : vector<4x128xf32>
    %201 = arith.addf %197, %200 : vector<4x128xf32>
    %cst_44 = arith.constant 5.000000e-01 : f32
    %202 = vector.broadcast %cst_44 : f32 to vector<4x128xf32>
    %203 = arith.mulf %202, %201 : vector<4x128xf32>
    %204 = math.tanh %203 : vector<4x128xf32>
    %cst_45 = arith.constant 5.000000e-01 : f32
    %205 = vector.broadcast %cst_45 : f32 to vector<4x128xf32>
    %206 = arith.mulf %205, %204 : vector<4x128xf32>
    %cst_46 = arith.constant 5.000000e-01 : f32
    %207 = vector.broadcast %cst_46 : f32 to vector<4x128xf32>
    %208 = arith.addf %206, %207 : vector<4x128xf32>
    %c30 = arith.constant 30 : index
    %209 = memref.load %arg2[%c30] : memref<42xf32, #tpu.memory_space<smem>>
    %210 = vector.broadcast %209 : f32 to vector<4x128xf32>
    %211 = arith.mulf %166, %210 : vector<4x128xf32>
    %c9_47 = arith.constant 9 : index
    %212 = memref.load %arg3[%c9_47] : memref<13xf32, #tpu.memory_space<smem>>
    %213 = vector.broadcast %212 : f32 to vector<4x128xf32>
    %214 = arith.addf %211, %213 : vector<4x128xf32>
    %c33 = arith.constant 33 : index
    %215 = memref.load %arg2[%c33] : memref<42xf32, #tpu.memory_space<smem>>
    %216 = vector.broadcast %215 : f32 to vector<4x128xf32>
    %217 = arith.mulf %187, %216 : vector<4x128xf32>
    %218 = arith.addf %214, %217 : vector<4x128xf32>
    %c36 = arith.constant 36 : index
    %219 = memref.load %arg2[%c36] : memref<42xf32, #tpu.memory_space<smem>>
    %220 = vector.broadcast %219 : f32 to vector<4x128xf32>
    %221 = arith.mulf %208, %220 : vector<4x128xf32>
    %222 = arith.addf %218, %221 : vector<4x128xf32>
    %cst_48 = arith.constant 5.000000e-01 : f32
    %223 = vector.broadcast %cst_48 : f32 to vector<4x128xf32>
    %224 = arith.mulf %223, %222 : vector<4x128xf32>
    %225 = math.tanh %224 : vector<4x128xf32>
    %cst_49 = arith.constant 5.000000e-01 : f32
    %226 = vector.broadcast %cst_49 : f32 to vector<4x128xf32>
    %227 = arith.mulf %226, %225 : vector<4x128xf32>
    %cst_50 = arith.constant 5.000000e-01 : f32
    %228 = vector.broadcast %cst_50 : f32 to vector<4x128xf32>
    %229 = arith.addf %227, %228 : vector<4x128xf32>
    %c31 = arith.constant 31 : index
    %230 = memref.load %arg2[%c31] : memref<42xf32, #tpu.memory_space<smem>>
    %231 = vector.broadcast %230 : f32 to vector<4x128xf32>
    %232 = arith.mulf %166, %231 : vector<4x128xf32>
    %c10_51 = arith.constant 10 : index
    %233 = memref.load %arg3[%c10_51] : memref<13xf32, #tpu.memory_space<smem>>
    %234 = vector.broadcast %233 : f32 to vector<4x128xf32>
    %235 = arith.addf %232, %234 : vector<4x128xf32>
    %c34 = arith.constant 34 : index
    %236 = memref.load %arg2[%c34] : memref<42xf32, #tpu.memory_space<smem>>
    %237 = vector.broadcast %236 : f32 to vector<4x128xf32>
    %238 = arith.mulf %187, %237 : vector<4x128xf32>
    %239 = arith.addf %235, %238 : vector<4x128xf32>
    %c37 = arith.constant 37 : index
    %240 = memref.load %arg2[%c37] : memref<42xf32, #tpu.memory_space<smem>>
    %241 = vector.broadcast %240 : f32 to vector<4x128xf32>
    %242 = arith.mulf %208, %241 : vector<4x128xf32>
    %243 = arith.addf %239, %242 : vector<4x128xf32>
    %cst_52 = arith.constant 5.000000e-01 : f32
    %244 = vector.broadcast %cst_52 : f32 to vector<4x128xf32>
    %245 = arith.mulf %244, %243 : vector<4x128xf32>
    %246 = math.tanh %245 : vector<4x128xf32>
    %cst_53 = arith.constant 5.000000e-01 : f32
    %247 = vector.broadcast %cst_53 : f32 to vector<4x128xf32>
    %248 = arith.mulf %247, %246 : vector<4x128xf32>
    %cst_54 = arith.constant 5.000000e-01 : f32
    %249 = vector.broadcast %cst_54 : f32 to vector<4x128xf32>
    %250 = arith.addf %248, %249 : vector<4x128xf32>
    %c32 = arith.constant 32 : index
    %251 = memref.load %arg2[%c32] : memref<42xf32, #tpu.memory_space<smem>>
    %252 = vector.broadcast %251 : f32 to vector<4x128xf32>
    %253 = arith.mulf %166, %252 : vector<4x128xf32>
    %c11_55 = arith.constant 11 : index
    %254 = memref.load %arg3[%c11_55] : memref<13xf32, #tpu.memory_space<smem>>
    %255 = vector.broadcast %254 : f32 to vector<4x128xf32>
    %256 = arith.addf %253, %255 : vector<4x128xf32>
    %c35 = arith.constant 35 : index
    %257 = memref.load %arg2[%c35] : memref<42xf32, #tpu.memory_space<smem>>
    %258 = vector.broadcast %257 : f32 to vector<4x128xf32>
    %259 = arith.mulf %187, %258 : vector<4x128xf32>
    %260 = arith.addf %256, %259 : vector<4x128xf32>
    %c38 = arith.constant 38 : index
    %261 = memref.load %arg2[%c38] : memref<42xf32, #tpu.memory_space<smem>>
    %262 = vector.broadcast %261 : f32 to vector<4x128xf32>
    %263 = arith.mulf %208, %262 : vector<4x128xf32>
    %264 = arith.addf %260, %263 : vector<4x128xf32>
    %cst_56 = arith.constant 5.000000e-01 : f32
    %265 = vector.broadcast %cst_56 : f32 to vector<4x128xf32>
    %266 = arith.mulf %265, %264 : vector<4x128xf32>
    %267 = math.tanh %266 : vector<4x128xf32>
    %cst_57 = arith.constant 5.000000e-01 : f32
    %268 = vector.broadcast %cst_57 : f32 to vector<4x128xf32>
    %269 = arith.mulf %268, %267 : vector<4x128xf32>
    %cst_58 = arith.constant 5.000000e-01 : f32
    %270 = vector.broadcast %cst_58 : f32 to vector<4x128xf32>
    %271 = arith.addf %269, %270 : vector<4x128xf32>
    %c39 = arith.constant 39 : index
    %272 = memref.load %arg2[%c39] : memref<42xf32, #tpu.memory_space<smem>>
    %273 = vector.broadcast %272 : f32 to vector<4x128xf32>
    %274 = arith.mulf %229, %273 : vector<4x128xf32>
    %c12_59 = arith.constant 12 : index
    %275 = memref.load %arg3[%c12_59] : memref<13xf32, #tpu.memory_space<smem>>
    %276 = vector.broadcast %275 : f32 to vector<4x128xf32>
    %277 = arith.addf %274, %276 : vector<4x128xf32>
    %c40 = arith.constant 40 : index
    %278 = memref.load %arg2[%c40] : memref<42xf32, #tpu.memory_space<smem>>
    %279 = vector.broadcast %278 : f32 to vector<4x128xf32>
    %280 = arith.mulf %250, %279 : vector<4x128xf32>
    %281 = arith.addf %277, %280 : vector<4x128xf32>
    %c41 = arith.constant 41 : index
    %282 = memref.load %arg2[%c41] : memref<42xf32, #tpu.memory_space<smem>>
    %283 = vector.broadcast %282 : f32 to vector<4x128xf32>
    %284 = arith.mulf %271, %283 : vector<4x128xf32>
    %285 = arith.addf %281, %284 : vector<4x128xf32>
    %cst_60 = arith.constant 5.000000e-01 : f32
    %286 = vector.broadcast %cst_60 : f32 to vector<4x128xf32>
    %287 = arith.mulf %286, %285 : vector<4x128xf32>
    %288 = math.tanh %287 : vector<4x128xf32>
    %cst_61 = arith.constant 5.000000e-01 : f32
    %289 = vector.broadcast %cst_61 : f32 to vector<4x128xf32>
    %290 = arith.mulf %289, %288 : vector<4x128xf32>
    %cst_62 = arith.constant 5.000000e-01 : f32
    %291 = vector.broadcast %cst_62 : f32 to vector<4x128xf32>
    %292 = arith.addf %290, %291 : vector<4x128xf32>
    %c0_63 = arith.constant 0 : index
    %c0_64 = arith.constant 0 : index
    %c0_65 = arith.constant 0 : index
    %293 = vector.load %arg4[%c0_63, %c0_64, %c0_65] : memref<1x4x128xf32, #tpu.memory_space<vmem>>, vector<1x4x128xf32>
    %294 = vector.shape_cast %293 : vector<1x4x128xf32> to vector<4x128xf32>
    %295 = vector.shape_cast %292 : vector<4x128xf32> to vector<1x4x128xf32>
    tpu.vector_store %arg4[%c0_63, %c0_64, %c0_65], %295 {strides = array<i32>} : memref<1x4x128xf32, #tpu.memory_space<vmem>>, vector<1x4x128xf32>,
    return
  }
  func.func @transform_0(%arg0: i32) -> (i32, i32, i32) {
    %c0_i32 = arith.constant 0 : i32
    %c0_i32_0 = arith.constant 0 : i32
    %c0_i32_1 = arith.constant 0 : i32
    return %c0_i32, %arg0, %c0_i32_0 : i32, i32, i32
  }
  func.func @transform_1(%arg0: i32) -> i32 {
    %c0_i32 = arith.constant 0 : i32
    %c0_i32_0 = arith.constant 0 : i32
    return %c0_i32 : i32
  }
  func.func @transform_2(%arg0: i32) -> i32 {
    %c0_i32 = arith.constant 0 : i32
    %c0_i32_0 = arith.constant 0 : i32
    return %c0_i32 : i32
  }
  func.func @transform_3(%arg0: i32) -> (i32, i32, i32) {
    %c0_i32 = arith.constant 0 : i32
    %c0_i32_0 = arith.constant 0 : i32
    %c0_i32_1 = arith.constant 0 : i32
    return %c0_i32, %arg0, %c0_i32_0 : i32, i32, i32
  }
}

</mosaic_0001>

<bundles_post_ra>
// kernel: tpu_custom_call.1
= control target key start
LH: loop header
LB: loop body
LE: loop exit
PB: predicated region body
PF: predicated region fallthrough
CT: control target
= control target key end

     0   :  { %8 = vsyncpa [#allocation3], 0  ;;  %s635_s0 = inlined_call_operand.hbm [shape: f32[4,4,128], index: 0, kind: input, shape index: {}]   ;;  %s636_s1 = inlined_call_operand.vmem [shape: f32[42], index: 1, kind: input, shape index: {}]   ;;  %s637_s2 = inlined_call_operand.vmem [shape: f32[13], index: 2, kind: input, shape index: {}]   ;;  %s638_s3 = inlined_call_operand.hbm [shape: f32[1,4,128], index: 3, kind: output, shape index: {}]  }
   0x1   :  { %9 = vsyncpa [#allocation5], 0 }
   0x2   :  { %10 = vsyncpa [#allocation8], 0 }
   0x3   :  { %11 = vsyncpa [#allocation4], 0  ;;  %s486_s12 = smov [#allocation2]   ;;  %s30_s16 = sshll.u32 %s636_s1, 4  ;;  %s31_s16 = int_to_ptr.vmem [resolvable:$true] %s30_s16 }
   0x4   :  { %s17_s13 = sshll.u32 %s486_s12, 4  ;;  %s410_s19 = scalar_lea.hbm %s635_s0, 256  ;;  %s18_s13 = int_to_ptr.vmem [resolvable:$true] %s17_s13 }
   0x5   :  { %p411_p0 = scmp.ne.s32.totalorder %s635_s0, %s410_s19  ;;  %p414_p1 = scmp.lt.u32.totalorder %s410_s19, %s635_s0 }
   0x7   :  { %p416_p2 = pnand %p414_p1, %p411_p0 }
   0x9   :  { %419 = shalt.err (!%p416_p2)
}
   0xa   :  { %s420_s24 = scalar_lea.vmem %s18_s13, 256  ;;  %p425_p4 = scmp.lt.s32.totalorder %s18_s13, %s18_s13 }
   0xb   :  { %p421_p3 = scmp.ne.s32.totalorder %s18_s13, %s420_s24  ;;  %p426_p5 = scmp.lt.s32.totalorder %s420_s24, %s420_s24 }
   0xd   :  { %p427_p6 = por %p426_p5, %p425_p4 }
   0xf   :  { %p428_p7 = pnand %p427_p6, %p421_p3 }
  0x11   :  { %431 = shalt.err (!%p428_p7)
}
  0x12   :  { %s487_s1 = smov 64   ;;  %s488_s25 = smov 4  }
  0x13   :  { %23 = dma.hbm_to_vmem [thread:$0]  %s635_s0, 256, %s18_s13, [#allocation3], %s487_s1, %s487_s1, %s488_s25  }
  0x14   :  { %s432_s28 = scalar_lea.vmem %s31_s16, 16  ;;  %p437_p9 = scmp.lt.s32.totalorder %s31_s16, %s31_s16 }
  0x15   :  { %p433_p8 = scmp.ne.s32.totalorder %s31_s16, %s432_s28  ;;  %p438_p10 = scmp.lt.s32.totalorder %s432_s28, %s432_s28 }
  0x17   :  { %p439_p11 = por %p438_p10, %p437_p9 }
  0x19   :  { %p440_p12 = pnand %p439_p11, %p433_p8 }
  0x1b   :  { %443 = shalt.err (!%p440_p12)
}
  0x1c   :  { %s489_s29 = smov [#allocation6]   ;;  %s40_s5 = sshll.u32 %s637_s2, 4  ;;  %s41_s5 = int_to_ptr.vmem [resolvable:$true] %s40_s5 }
  0x1d   :  { %33 = dma.vmem_to_smem %s31_s16, 16, %s489_s29, [#allocation5]  }
  0x1e   :  { %s444_s6 = scalar_lea.vmem %s41_s5, 16  ;;  %p449_p0 = scmp.lt.s32.totalorder %s41_s5, %s41_s5 }
  0x1f   :  { %p445_p13 = scmp.ne.s32.totalorder %s41_s5, %s444_s6  ;;  %p450_p1 = scmp.lt.s32.totalorder %s444_s6, %s444_s6 }
  0x21   :  { %p451_p2 = por %p450_p1, %p449_p0 }
  0x23   :  { %p452_p3 = pnand %p451_p2, %p445_p13 }
  0x25   :  { %455 = shalt.err (!%p452_p3)
}
  0x26   :  { %s490_s0 = smov [#allocation7]  }
  0x27   :  { %43 = dma.vmem_to_smem %s41_s5, 16, %s490_s0, [#allocation8]  }
  0x28   :  { %478 = dma.done.wait [#allocation3], 256  }
  0x29   :  { %479 = vsyncadd [#allocation3], 4294967040 }
  0x2a   :  { %480 = dma.done.wait [#allocation5], 16  }
  0x2b   :  { %481 = vsyncadd [#allocation5], 4294967280 }
  0x2c   :  { %482 = dma.done.wait [#allocation8], 16  }
  0x2d   :  { %483 = vsyncadd [#allocation8], 4294967280 }
  0x2e   :  { %53 = sfence }
  0x2f   :  { %s61_s7 = sld [smem:[#allocation6]]  ;;  %s325_s2 = sld [smem:[#allocation6 + $0x3]]  ;;  %v54_v0 = vld [vmem:[#allocation2] sm:$0xf]  ;;  %v56_v1 = vld [vmem:[#allocation2 + $0x4] sm:$0xf] }
  0x30   :  { %s64_s8 = sld [smem:[#allocation7]]  ;;  %s326_s9 = sld [smem:[#allocation6 + $0x6]]  ;;  %v58_v2 = vld [vmem:[#allocation2 + $0x8] sm:$0xf]  ;;  %v60_v5 = vld [vmem:[#allocation2 + $0xc] sm:$0xf] }
  0x31   :  { %s327_s10 = sld [smem:[#allocation6 + $0x9]]  ;;  %s330_s13 = sld [smem:[#allocation6 + $0x4]] }
  0x32   :  { %s328_s11 = sld [smem:[#allocation6 + $0x1]]  ;;  %s331_s14 = sld [smem:[#allocation6 + $0x7]] }
  0x33   :  { %s329_s12 = sld [smem:[#allocation7 + $0x1]]  ;;  %s332_s15 = sld [smem:[#allocation6 + $0xa]] }
  0x34   :  { %s530_s16 = sld [smem:[#allocation6 + $0x2]]  ;;  %s335_s18 = sld [smem:[#allocation6 + $0x5]] }
  0x35   :  { %s532_s17 = sld [smem:[#allocation7 + $0x2]]  ;;  %v62_v3 = vstv %s61_s7  ;;  %s534_s19 = sld [smem:[#allocation6 + $0x8]]  ;;  %v68_v7 = vstv %s325_s2 }
  0x36   :  { %v65_v4 = vstv %s64_s8  ;;  %v63_v6 = vmul.f32 %v62_v3, %v54_v0  ;;  %v72_v8 = vstv %s326_s9  ;;  %s536_s20 = sld [smem:[#allocation6 + $0xb]]  ;;  %v69_v9 = vmul.f32 %v68_v7, %v56_v1  ;;  %s338_s21 = sld [smem:[#allocation6 + $0xc]] }
  0x37   :  { %v76_v10 = vstv %s327_s10  ;;  %v73_v13 = vmul.f32 %v72_v8, %v58_v2  ;;  %v90_v17 = vstv %s330_s13  ;;  %s542_s22 = sld [smem:[#allocation7 + $0x3]]  ;;  %s544_s23 = sld [smem:[#allocation6 + $0xf]] }
  0x38   :  { %v84_v11 = vstv %s328_s11  ;;  %v66_v12 = vadd.f32 %v65_v4, %v63_v6  ;;  %v77_v16 = vmul.f32 %v76_v10, %v60_v5  ;;  %v94_v18 = vstv %s331_s14  ;;  %s342_s24 = sld [smem:[#allocation6 + $0xd]]  ;;  %s346_s1 = sld [smem:[#allocation6 + $0xe]] }
  0x39   :  { %v85_v14 = vmul.f32 %v84_v11, %v54_v0  ;;  %v87_v15 = vstv %s329_s12  ;;  %v98_v19 = vstv %s332_s15  ;;  %v91_v22 = vmul.f32 %v90_v17, %v56_v1  ;;  %s546_s25 = sld [smem:[#allocation7 + $0x4]]  ;;  %s548_s26 = sld [smem:[#allocation6 + $0x10]] }
  0x3a   :  { %v70_v20 = vadd.f32 %v69_v9, %v66_v12  ;;  %v95_v23 = vmul.f32 %v94_v18, %v58_v2  ;;  %v99_v24 = vmul.f32 %v98_v19, %v60_v5  ;;  %v106_v25 = vstv %s530_s16  ;;  %s550_s27 = sld [smem:[#allocation7 + $0x5]]  ;;  %s552_s28 = sld [smem:[#allocation6 + $0x11]] }
  0x3b   :  { %v88_v21 = vadd.f32 %v87_v15, %v85_v14  ;;  %v109_v26 = vstv %s532_s17  ;;  %v112_v27 = vstv %s335_s18  ;;  %v107_v30 = vmul.f32 %v106_v25, %v54_v0  ;;  %s554_s29 = sld [smem:[#allocation6 + $0x12]]  ;;  %s556_s30 = sld [smem:[#allocation6 + $0x13]] }
  0x3c   :  { %v74_v28 = vadd.f32 %v73_v13, %v70_v20  ;;  %v113_v31 = vmul.f32 %v112_v27, %v56_v1  ;;  %v116_v32 = vstv %s534_s19  ;;  %v120_v33 = vstv %s536_s20  ;;  %s558_s4 = sld [smem:[#allocation6 + $0x14]]  ;;  %s569_s5 = sld [smem:[#allocation6 + $0x15]] }
  0x3d   :  { %v92_v29 = vadd.f32 %v91_v22, %v88_v21  ;;  %v110_v36 = vadd.f32 %v109_v26, %v107_v30  ;;  %v117_v37 = vmul.f32 %v116_v32, %v58_v2  ;;  %v121_v41 = vmul.f32 %v120_v33, %v60_v5  ;;  %s571_s6 = sld [smem:[#allocation7 + $0x6]]  ;;  %s573_s0 = sld [smem:[#allocation6 + $0x18]] }
  0x3e   :  { %v78_v34 = vadd.f32 %v77_v16, %v74_v28  ;;  %v128_v49 = vstv %s338_s21  ;;  %v146_v50 = vstv %s342_s24  ;;  %v164_v51 = vstv %s346_s1  ;;  %s575_s7 = sld [smem:[#allocation6 + $0x1b]]  ;;  %s354_s8 = sld [smem:[#allocation6 + $0x16]] }
  0x3f   :  { %v96_v35 = vadd.f32 %v95_v23, %v92_v29  ;;  %v114_v40 = vadd.f32 %v113_v31, %v110_v36  ;;  %v131_v54 = vstv %s542_s22  ;;  %v134_v55 = vstv %s544_s23  ;;  %s577_s2 = sld [smem:[#allocation7 + $0x7]]  ;;  %s579_s9 = sld [smem:[#allocation6 + $0x19]] }
  0x40   :  { %v79_v38 = vmul.f32 0.5, %v78_v34  ;;  %v149_v56 = vstv %s546_s25  ;;  %v152_v57 = vstv %s548_s26  ;;  %v167_v58 = vstv %s550_s27  ;;  %s358_s10 = sld [smem:[#allocation6 + $0x17]]  ;;  %s581_s11 = sld [smem:[#allocation6 + $0x1c]] }
  0x41   :  { %v100_v39 = vadd.f32 %v99_v24, %v96_v35  ;;  %v118_v43 = vadd.f32 %v117_v37, %v114_v40  ;;  %v170_v59 = vstv %s552_s28  ;;  %v138_v1 = vstv %s554_s29  ;;  %s360_s12 = sld [smem:[#allocation6 + $0x1a]]  ;;  %s583_s13 = sld [smem:[#allocation7 + $0x8]] }
  0x42   :  { %384 = vtanh.f32 %v79_v38  ;;  %v156_v2 = vstv %s556_s30  ;;  %v174_v10 = vstv %s558_s4  ;;  %s585_s14 = sld [smem:[#allocation6 + $0x1d]]  ;;  %v182_v25 = vstv %s569_s5  ;;  %s596_s15 = sld [smem:[#allocation6 + $0x1e]] }
  0x43   :  { %v101_v42 = vmul.f32 0.5, %v100_v39  ;;  %v122_v44 = vadd.f32 %v121_v41, %v118_v43  ;;  %v185_v28 = vstv %s571_s6  ;;  %v188_v29 = vstv %s573_s0  ;;  %s598_s16 = sld [smem:[#allocation7 + $0x9]]  ;;  %s602_s18 = sld [smem:[#allocation6 + $0x24]] }
  0x44   :  { %v192_v30 = vstv %s575_s7  ;;  %v200_v33 = vstv %s354_s8  ;;  %s600_s17 = sld [smem:[#allocation6 + $0x21]]  ;;  %s366_s19 = sld [smem:[#allocation6 + $0x1f]] }
  0x45   :  { %386 = vtanh.f32 %v101_v42  ;;  %v123_v45 = vmul.f32 0.5, %v122_v44  ;;  %v203_v34 = vstv %s577_s2  ;;  %v206_v38 = vstv %s579_s9  ;;  %s604_s20 = sld [smem:[#allocation7 + $0xa]]  ;;  %s370_s22 = sld [smem:[#allocation6 + $0x20]] }
  0x46   :  { %v218_v35 = vstv %s358_s10  ;;  %v210_v41 = vstv %s581_s11  ;;  %s606_s21 = sld [smem:[#allocation6 + $0x22]]  ;;  %s608_s23 = sld [smem:[#allocation6 + $0x25]] }
  0x47   :  { %388 = vtanh.f32 %v123_v45  ;;  %v224_v39 = vstv %s360_s12  ;;  %v221_v42 = vstv %s583_s13  ;;  %s372_s24 = sld [smem:[#allocation6 + $0x23]]  ;;  %s612_s25 = sld [smem:[#allocation6 + $0x26]] }
  0x48   :  { %v228_v43 = vstv %s585_s14  ;;  %s610_s1 = sld [smem:[#allocation7 + $0xb]]  ;;  %s374_s26 = sld [smem:[#allocation6 + $0x27]] }
  0x49   :  { %s376_s27 = sld [smem:[#allocation6 + $0x28]]  ;;  %s375_s28 = sld [smem:[#allocation7 + $0xc]] }
  0x4a   :  { %s377_s29 = sld [smem:[#allocation6 + $0x29]]  ;;  %s491_s30 = smov [#allocation9]  }
  0x4b   :  { %s314_s4 = sshll.u32 %s491_s30, 4  ;;  %s315_s4 = int_to_ptr.vmem [resolvable:$true] %s314_s4 }
  0x4c   :  { %v385_v46 = vpop.eup %384  ;;  %s456_s5 = scalar_lea.vmem %s315_s4, 64  ;;  %p461_p5 = scmp.lt.s32.totalorder %s315_s4, %s315_s4 }
  0x4d   :  { %v81_v47 = vmul.f32 0.5, %v385_v46  ;;  %p457_p4 = scmp.ne.s32.totalorder %s315_s4, %s456_s5  ;;  %p462_p6 = scmp.lt.s32.totalorder %s456_s5, %s456_s5 }
  0x4f   :  { %v387_v48 = vpop.eup %386  ;;  %v82_v52 = vadd.f32 0.5, %v81_v47  ;;  %p463_p7 = por %p462_p6, %p461_p5 }
  0x50   :  { %v103_v53 = vmul.f32 0.5, %v387_v48 }
  0x51   :  { %v129_v61 = vmul.f32 %v128_v49, %v82_v52  ;;  %v147_v62 = vmul.f32 %v146_v50, %v82_v52  ;;  %v165_v63 = vmul.f32 %v164_v51, %v82_v52  ;;  %v389_v0 = vpop.eup %388  ;;  %p464_p8 = pnand %p463_p7, %p457_p4 }
  0x52   :  { %v104_v60 = vadd.f32 0.5, %v103_v53  ;;  %v125_v3 = vmul.f32 0.5, %v389_v0 }
  0x53   :  { %v132_v4 = vadd.f32 %v131_v54, %v129_v61  ;;  %v150_v6 = vadd.f32 %v149_v56, %v147_v62  ;;  %v168_v8 = vadd.f32 %v167_v58, %v165_v63 }
  0x54   :  { %v135_v5 = vmul.f32 %v134_v55, %v104_v60  ;;  %v153_v7 = vmul.f32 %v152_v57, %v104_v60  ;;  %v171_v9 = vmul.f32 %v170_v59, %v104_v60  ;;  %v126_v11 = vadd.f32 0.5, %v125_v3 }
  0x55   :  { %v236_v3 = vstv %s596_s15 }
  0x56   :  { %v136_v12 = vadd.f32 %v135_v5, %v132_v4  ;;  %v154_v13 = vadd.f32 %v153_v7, %v150_v6  ;;  %v172_v14 = vadd.f32 %v171_v9, %v168_v8  ;;  %v139_v15 = vmul.f32 %v138_v1, %v126_v11 }
  0x57   :  { %v157_v16 = vmul.f32 %v156_v2, %v126_v11  ;;  %v175_v17 = vmul.f32 %v174_v10, %v126_v11  ;;  %v239_v6 = vstv %s598_s16  ;;  %v242_v7 = vstv %s600_s17 }
  0x58   :  { %v140_v18 = vadd.f32 %v139_v15, %v136_v12  ;;  %v246_v8 = vstv %s602_s18  ;;  %v254_v11 = vstv %s366_s19  ;;  %v257_v12 = vstv %s604_s20 }
  0x59   :  { %v158_v19 = vadd.f32 %v157_v16, %v154_v13  ;;  %v176_v20 = vadd.f32 %v175_v17, %v172_v14  ;;  %v272_v13 = vstv %s370_s22  ;;  %v260_v16 = vstv %s606_s21 }
  0x5a   :  { %v141_v21 = vmul.f32 0.5, %v140_v18  ;;  %v278_v17 = vstv %s372_s24 }
  0x5b   :  { %v159_v22 = vmul.f32 0.5, %v158_v19  ;;  %v177_v23 = vmul.f32 0.5, %v176_v20  ;;  %v264_v19 = vstv %s608_s23  ;;  %v275_v20 = vstv %s610_s1 }
  0x5c   :  { %390 = vtanh.f32 %v141_v21  ;;  %v282_v21 = vstv %s612_s25 }
  0x5d   :  { %392 = vtanh.f32 %v159_v22 }
  0x5e   :  { %394 = vtanh.f32 %v177_v23 }
  0x66   :  { %v391_v24 = vpop.eup %390 }
  0x67   :  { %v393_v26 = vpop.eup %392  ;;  %v143_v27 = vmul.f32 0.5, %v391_v24 }
  0x68   :  { %v395_v31 = vpop.eup %394  ;;  %v161_v32 = vmul.f32 0.5, %v393_v26 }
  0x69   :  { %v144_v36 = vadd.f32 0.5, %v143_v27  ;;  %v179_v37 = vmul.f32 0.5, %v395_v31 }
  0x6a   :  { %v162_v40 = vadd.f32 0.5, %v161_v32 }
  0x6b   :  { %v180_v44 = vadd.f32 0.5, %v179_v37  ;;  %v183_v45 = vmul.f32 %v182_v25, %v144_v36  ;;  %v201_v46 = vmul.f32 %v200_v33, %v144_v36  ;;  %v219_v47 = vmul.f32 %v218_v35, %v144_v36 }
  0x6c   :  { %v189_v48 = vmul.f32 %v188_v29, %v162_v40  ;;  %v207_v49 = vmul.f32 %v206_v38, %v162_v40  ;;  %v225_v50 = vmul.f32 %v224_v39, %v162_v40 }
  0x6d   :  { %v186_v51 = vadd.f32 %v185_v28, %v183_v45  ;;  %v193_v52 = vmul.f32 %v192_v30, %v180_v44  ;;  %v204_v53 = vadd.f32 %v203_v34, %v201_v46  ;;  %v211_v54 = vmul.f32 %v210_v41, %v180_v44 }
  0x6e   :  { %v222_v55 = vadd.f32 %v221_v42, %v219_v47  ;;  %v229_v56 = vmul.f32 %v228_v43, %v180_v44 }
  0x6f   :  { %v190_v57 = vadd.f32 %v189_v48, %v186_v51  ;;  %v208_v58 = vadd.f32 %v207_v49, %v204_v53  ;;  %v290_v49 = vstv %s374_s26 }
  0x70   :  { %v226_v59 = vadd.f32 %v225_v50, %v222_v55  ;;  %v300_v55 = vstv %s377_s29 }
  0x71   :  { %v194_v60 = vadd.f32 %v193_v52, %v190_v57  ;;  %v212_v61 = vadd.f32 %v211_v54, %v208_v58  ;;  %v296_v52 = vstv %s376_s27  ;;  %v293_v54 = vstv %s375_s28 }
  0x72   :  { %v230_v62 = vadd.f32 %v229_v56, %v226_v59 }
  0x73   :  { %v195_v63 = vmul.f32 0.5, %v194_v60  ;;  %v213_v0 = vmul.f32 0.5, %v212_v61 }
  0x74   :  { %v231_v1 = vmul.f32 0.5, %v230_v62 }
  0x75   :  { %396 = vtanh.f32 %v195_v63 }
  0x76   :  { %398 = vtanh.f32 %v213_v0 }
  0x77   :  { %400 = vtanh.f32 %v231_v1 }
  0x7f   :  { %v397_v2 = vpop.eup %396 }
  0x80   :  { %v399_v4 = vpop.eup %398  ;;  %v197_v5 = vmul.f32 0.5, %v397_v2 }
  0x81   :  { %v401_v9 = vpop.eup %400  ;;  %v215_v10 = vmul.f32 0.5, %v399_v4 }
  0x82   :  { %v198_v14 = vadd.f32 0.5, %v197_v5  ;;  %v233_v15 = vmul.f32 0.5, %v401_v9 }
  0x83   :  { %v216_v18 = vadd.f32 0.5, %v215_v10 }
  0x84   :  { %v234_v22 = vadd.f32 0.5, %v233_v15  ;;  %v237_v23 = vmul.f32 %v236_v3, %v198_v14  ;;  %v255_v24 = vmul.f32 %v254_v11, %v198_v14  ;;  %v273_v25 = vmul.f32 %v272_v13, %v198_v14 }
  0x85   :  { %v243_v26 = vmul.f32 %v242_v7, %v216_v18  ;;  %v261_v27 = vmul.f32 %v260_v16, %v216_v18  ;;  %v279_v28 = vmul.f32 %v278_v17, %v216_v18 }
  0x86   :  { %v240_v29 = vadd.f32 %v239_v6, %v237_v23  ;;  %v247_v30 = vmul.f32 %v246_v8, %v234_v22  ;;  %v258_v31 = vadd.f32 %v257_v12, %v255_v24  ;;  %v265_v32 = vmul.f32 %v264_v19, %v234_v22 }
  0x87   :  { %v276_v33 = vadd.f32 %v275_v20, %v273_v25  ;;  %v283_v34 = vmul.f32 %v282_v21, %v234_v22 }
  0x88   :  { %v244_v35 = vadd.f32 %v243_v26, %v240_v29  ;;  %v262_v36 = vadd.f32 %v261_v27, %v258_v31 }
  0x89   :  { %v280_v37 = vadd.f32 %v279_v28, %v276_v33 }
  0x8a   :  { %v248_v38 = vadd.f32 %v247_v30, %v244_v35  ;;  %v266_v39 = vadd.f32 %v265_v32, %v262_v36 }
  0x8b   :  { %v284_v40 = vadd.f32 %v283_v34, %v280_v37 }
  0x8c   :  { %v249_v41 = vmul.f32 0.5, %v248_v38  ;;  %v267_v42 = vmul.f32 0.5, %v266_v39 }
  0x8d   :  { %v285_v43 = vmul.f32 0.5, %v284_v40 }
  0x8e   :  { %402 = vtanh.f32 %v249_v41 }
  0x8f   :  { %404 = vtanh.f32 %v267_v42 }
  0x90   :  { %406 = vtanh.f32 %v285_v43 }
  0x98   :  { %v403_v44 = vpop.eup %402 }
  0x99   :  { %v405_v45 = vpop.eup %404  ;;  %v251_v46 = vmul.f32 0.5, %v403_v44 }
  0x9a   :  { %v407_v47 = vpop.eup %406  ;;  %v269_v48 = vmul.f32 0.5, %v405_v45 }
  0x9b   :  { %v252_v50 = vadd.f32 0.5, %v251_v46  ;;  %v287_v51 = vmul.f32 0.5, %v407_v47 }
  0x9c   :  { %v270_v53 = vadd.f32 0.5, %v269_v48 }
  0x9d   :  { %v288_v56 = vadd.f32 0.5, %v287_v51  ;;  %v291_v57 = vmul.f32 %v290_v49, %v252_v50 }
  0x9e   :  { %v297_v58 = vmul.f32 %v296_v52, %v270_v53 }
  0x9f   :  { %v294_v59 = vadd.f32 %v293_v54, %v291_v57  ;;  %v301_v60 = vmul.f32 %v300_v55, %v288_v56 }
  0xa1   :  { %v298_v61 = vadd.f32 %v297_v58, %v294_v59 }
  0xa3   :  { %v302_v62 = vadd.f32 %v301_v60, %v298_v61 }
  0xa5   :  { %v303_v63 = vmul.f32 0.5, %v302_v62 }
  0xa7   :  { %408 = vtanh.f32 %v303_v63 }
  0xb1   :  { %v409_v0 = vpop.eup %408 }
  0xb2   :  { %v305_v1 = vmul.f32 0.5, %v409_v0 }
  0xb4   :  { %v306_v2 = vadd.f32 0.5, %v305_v1 }
  0xb6   :  { %307 = vst [vmem:[#allocation9] sm:$0xf] %v306_v2 }
  0xb7   :  { %467 = shalt.err (!%p464_p8)
}
  0xb8   :  { %s468_s7 = scalar_lea.hbm %s638_s3, 64 }
  0xb9   :  { %p469_p9 = scmp.ne.s32.totalorder %s638_s3, %s468_s7  ;;  %p472_p10 = scmp.lt.u32.totalorder %s468_s7, %s638_s3 }
  0xbb   :  { %p474_p11 = pnand %p472_p10, %p469_p9 }
  0xbd   :  { %477 = shalt.err (!%p474_p11)
}
  0xbe   :  { %317 = dma.vmem_to_hbm [thread:$0]  %s315_s4, 64, %s638_s3, [#allocation4]  }
  0xbf   :  { %484 = dma.done.wait [#allocation4], 64  }
  0xc0   :  { %485 = vsyncadd [#allocation4], 4294967232 }
  0xc1   :  { %321 = vsyncpa [#allocation3], 1 }
  0xc2   :  { %322 = vsyncpa [#allocation4], 1 }
  0xc3   :  { %323 = vsyncpa [#allocation5], 1 }
  0xc4   :  { %324 = vsyncpa [#allocation8], 1 }

</bundles_post_ra>
